<compile_context>
chip_gen: v7x
topology: tpu7x:2x2x1
jax: 0.10.0
libtpu: 0.0.40
codegen_flags: <defaults>
</compile_context>

<pallas_src>
import math

import jax
import jax.numpy as jnp
from jax.experimental import pallas as pl
from jax.experimental.pallas import tpu as pltpu


def _self_attention_kernel(x_ref, w_ref, b_ref, o_ref):
    # x_ref: (TB, T, D)  VMEM  batch tile of inputs (any float dtype)
    # w_ref: (T, D)      VMEM  per-timestep score weights (atten_w squeezed)
    # b_ref: (T,)        SMEM  per-timestep score bias (scalars)
    # o_ref: (TB, D)     VMEM  f32 weighted sum over time (accumulated in place)
    T = x_ref.shape[1]

    o_ref[...] = jnp.zeros_like(o_ref)

    # T (window_size) is small and static -> unrolled Python loop. Live set is
    # just a couple of (TB, D) slabs; no (TB, T, D) temporaries are built.
    for t in range(T):
        xt = x_ref[:, t, :].astype(jnp.float32)            # (TB, D) VMEM read
        wt = w_ref[t:t + 1, :].astype(jnp.float32)         # (1, D)
        # score: lane-axis reduce over D (XLU), then EUP tanh.
        s = jnp.sum(xt * wt, axis=-1, keepdims=True)       # (TB, 1)
        a = jnp.tanh(s + b_ref[t])                         # (TB, 1)
        # weighted sum: cheap lane-broadcast of a over D on the VPU.
        o_ref[...] += a * xt                               # (TB, D)


def _round_down_8(n: int) -> int:
    return max(8, (n // 8) * 8)


def _round_up(n: int, m: int) -> int:
    return ((n + m - 1) // m) * m


def self_attention_forward(x: jax.Array,
                           atten_w: jax.Array,
                           atten_bias: jax.Array,
                           *,
                           target_tile_bytes: int = 2 << 20) -> jax.Array:
    """Pallas implementation of SelfAttention.forward.

    x         : (B, T, D) float32 or bfloat16
    atten_w   : (T, D, 1) float32   -- PyTorch parameter layout
    atten_bias: (T, 1, 1) float32
    returns   : (B, D)    float32
    """
    B, T, D = x.shape
    assert atten_w.shape == (T, D, 1)
    assert atten_bias.shape == (T, 1, 1)

    # Contiguous re-views only (drop size-1 dims): no extra HBM copies.
    w2d = atten_w.reshape(T, D)
    bvec = atten_bias.reshape(T).astype(jnp.float32)

    itemsize = jnp.dtype(x.dtype).itemsize
    row_bytes = T * D * itemsize

    # ---- budget-driven batch tile (multiple of 8 sublanes) -------------------
    bt = _round_down_8(target_tile_bytes // max(row_bytes, 1))
    bp = _round_up(B, 8)
    bt = min(bt, bp)
    # Keep at least 2 grid steps when the batch allows it, so both v7x
    # TensorCores get tiles and input DMA double-buffering stays alive.
    if bp > 8 and bt >= bp:
        bt = _round_down_8(bp // 2)
    bp = _round_up(B, bt)                      # pad batch to whole tiles
    grid = (bp // bt,)

    if bp != B:
        # Zero padding: padded rows produce exactly 0 in the output.
        x = jnp.pad(x, ((0, bp - B), (0, 0), (0, 0)))

    # ---- explicit VMEM budget: 2x double-buffered in/out + params + slack ----
    x_tile_bytes = bt * row_bytes
    out_tile_bytes = bt * D * 4
    need = 2 * x_tile_bytes + 2 * out_tile_bytes + T * D * 4 + (1 << 20)
    vmem_limit = int(min(max(int(need * 1.5), 16 << 20), 48 << 20))

    out = pl.pallas_call(
        _self_attention_kernel,
        out_shape=jax.ShapeDtypeStruct((bp, D), jnp.float32),
        grid=grid,
        in_specs=[
            # x: tile over batch; (T, D) are full-array dims -> legal blocks.
            pl.BlockSpec((bt, T, D), lambda i: (i, 0, 0)),
            # weights: tiny, replicated across the grid, VMEM-resident.
            pl.BlockSpec((T, D), lambda i: (0, 0)),
            # bias: T scalars in SMEM, read one scalar per timestep.
            pl.BlockSpec(memory_space=pltpu.MemorySpace.SMEM),
        ],
        out_specs=pl.BlockSpec((bt, D), lambda i: (i, 0)),
        compiler_params=pltpu.CompilerParams(
            dimension_semantics=("parallel",),
            vmem_limit_bytes=vmem_limit,
        ),
    )(x, w2d, bvec)

    return out[:B] if bp != B else out


def _reference(x, atten_w, atten_bias):
    # Literal transcription of the PyTorch forward.
    xt = jnp.transpose(x, (1, 0, 2))                       # (T, B, D)
    s = jnp.matmul(xt, atten_w) + atten_bias               # (T, B, 1)
    s = jnp.transpose(s, (1, 0, 2))                        # (B, T, 1)
    a = jnp.tanh(s)                                        # (B, T, 1)
    out = jnp.matmul(jnp.transpose(a, (0, 2, 1)), x)       # (B, 1, D)
    return jnp.squeeze(out, axis=1)                        # (B, D)  (B > 1)


if __name__ == "__main__":
    # Small shapes consistent with the module: seq_len = window_size,
    # input_size = hidden_size * num_directions (128 keeps the output store
    # lane-dense). Budget-driven tiling yields an 8-row tile -> 2 parallel
    # grid steps at this tiny batch.
    batch, seq_len, input_size = 16, 8, 128

    key = jax.random.PRNGKey(0)
    k_x, k_w, k_b = jax.random.split(key, 3)

    x = jax.random.normal(k_x, (batch, seq_len, input_size), dtype=jnp.float32)

    # Glorot-style init for atten_w (matches the module's glorot()); the module
    # zero-fills the bias at init — use small nonzero values here so the bias
    # path is actually exercised (forward semantics are identical).
    stdv = math.sqrt(6.0 / (input_size + 1))
    atten_w = jax.random.uniform(k_w, (seq_len, input_size, 1), jnp.float32,
                                 -stdv, stdv)
    atten_bias = jax.random.uniform(k_b, (seq_len, 1, 1), jnp.float32,
                                    -0.1, 0.1)

    out = self_attention_forward(x, atten_w, atten_bias)
    out = jax.block_until_ready(out)

    ref = _reference(x, atten_w, atten_bias)
    assert out.shape == (batch, input_size)
    assert jnp.allclose(out, ref, atol=1e-5, rtol=1e-5)

    # Also exercise a ragged batch (padding path) once.
    out_ragged = jax.block_until_ready(
        self_attention_forward(x[:13], atten_w, atten_bias))
    assert out_ragged.shape == (13, input_size)
    assert jnp.allclose(out_ragged, ref[:13], atol=1e-5, rtol=1e-5)

    print("KERNEL_OK")
</pallas_src>

<mosaic_0001>
module attributes {stable_mosaic.version = 11 : i64} {
  func.func @_self_attention_kernel(%arg0: i32, %arg1: memref<8x8x128xf32, #tpu.memory_space<vmem>>, %arg2: memref<8x128xf32, #tpu.memory_space<vmem>>, %arg3: memref<8xf32, #tpu.memory_space<smem>>, %arg4: memref<8x128xf32, #tpu.memory_space<vmem>>) attributes {dimension_semantics = [#tpu.dimension_semantics<parallel>], iteration_bounds = array<i64: 2>, scalar_prefetch = 0 : i64, scratch_operands = 0 : i64, tpu.core_type = #tpu.core_type<tc>, window_params = [{transform_indices = @transform_0, window_bounds = array<i64: 8, 8, 128>}, {pipeline_mode = #tpu.pipeline_mode<synchronous>, transform_indices = @transform_1, window_bounds = array<i64: 8, 128>}, {transform_indices = @transform_2, window_bounds = array<i64: 8>}, {transform_indices = @transform_3, window_bounds = array<i64: 8, 128>}]} {
    %cst = arith.constant 0.000000e+00 : f32
    %0 = vector.broadcast %cst : f32 to vector<8x128xf32>
    %c0 = arith.constant 0 : index
    %c0_0 = arith.constant 0 : index
    %1 = vector.load %arg4[%c0, %c0_0] : memref<8x128xf32, #tpu.memory_space<vmem>>, vector<8x128xf32>
    tpu.vector_store %arg4[%c0, %c0_0], %0 {strides = array<i32>} : memref<8x128xf32, #tpu.memory_space<vmem>>, vector<8x128xf32>,
    %c0_1 = arith.constant 0 : index
    %c0_2 = arith.constant 0 : index
    %c0_3 = arith.constant 0 : index
    %2 = vector.load %arg1[%c0_1, %c0_2, %c0_3] : memref<8x8x128xf32, #tpu.memory_space<vmem>>, vector<8x1x128xf32>
    %3 = vector.shape_cast %2 : vector<8x1x128xf32> to vector<8x128xf32>
    %c0_4 = arith.constant 0 : index
    %c0_5 = arith.constant 0 : index
    %4 = vector.load %arg2[%c0_4, %c0_5] : memref<8x128xf32, #tpu.memory_space<vmem>>, vector<1x128xf32>
    %5 = vector.broadcast %4 : vector<1x128xf32> to vector<8x128xf32>
    %6 = arith.mulf %3, %5 : vector<8x128xf32>
    %cst_6 = arith.constant dense<0.000000e+00> : vector<8xf32>
    %7 = vector.multi_reduction <add>, %6, %cst_6 [1] : vector<8x128xf32> to vector<8xf32>
    %8 = vector.shape_cast %7 : vector<8xf32> to vector<8x1xf32>
    %c0_7 = arith.constant 0 : index
    %9 = memref.load %arg3[%c0_7] : memref<8xf32, #tpu.memory_space<smem>>
    %10 = vector.broadcast %9 : f32 to vector<8x1xf32>
    %11 = arith.addf %8, %10 : vector<8x1xf32>
    %12 = math.tanh %11 : vector<8x1xf32>
    %c0_8 = arith.constant 0 : index
    %c0_9 = arith.constant 0 : index
    %13 = vector.load %arg4[%c0_8, %c0_9] : memref<8x128xf32, #tpu.memory_space<vmem>>, vector<8x128xf32>
    %14 = vector.broadcast %12 : vector<8x1xf32> to vector<8x128xf32>
    %15 = arith.mulf %14, %3 : vector<8x128xf32>
    %16 = arith.addf %13, %15 : vector<8x128xf32>
    %c0_10 = arith.constant 0 : index
    %c0_11 = arith.constant 0 : index
    %17 = vector.load %arg4[%c0_10, %c0_11] : memref<8x128xf32, #tpu.memory_space<vmem>>, vector<8x128xf32>
    tpu.vector_store %arg4[%c0_10, %c0_11], %16 {strides = array<i32>} : memref<8x128xf32, #tpu.memory_space<vmem>>, vector<8x128xf32>,
    %c0_12 = arith.constant 0 : index
    %c1 = arith.constant 1 : index
    %c0_13 = arith.constant 0 : index
    %18 = vector.load %arg1[%c0_12, %c1, %c0_13] : memref<8x8x128xf32, #tpu.memory_space<vmem>>, vector<8x1x128xf32>
    %19 = vector.shape_cast %18 : vector<8x1x128xf32> to vector<8x128xf32>
    %c1_14 = arith.constant 1 : index
    %c0_15 = arith.constant 0 : index
    %20 = vector.load %arg2[%c1_14, %c0_15] : memref<8x128xf32, #tpu.memory_space<vmem>>, vector<1x128xf32>
    %21 = vector.broadcast %20 : vector<1x128xf32> to vector<8x128xf32>
    %22 = arith.mulf %19, %21 : vector<8x128xf32>
    %cst_16 = arith.constant dense<0.000000e+00> : vector<8xf32>
    %23 = vector.multi_reduction <add>, %22, %cst_16 [1] : vector<8x128xf32> to vector<8xf32>
    %24 = vector.shape_cast %23 : vector<8xf32> to vector<8x1xf32>
    %c1_17 = arith.constant 1 : index
    %25 = memref.load %arg3[%c1_17] : memref<8xf32, #tpu.memory_space<smem>>
    %26 = vector.broadcast %25 : f32 to vector<8x1xf32>
    %27 = arith.addf %24, %26 : vector<8x1xf32>
    %28 = math.tanh %27 : vector<8x1xf32>
    %c0_18 = arith.constant 0 : index
    %c0_19 = arith.constant 0 : index
    %29 = vector.load %arg4[%c0_18, %c0_19] : memref<8x128xf32, #tpu.memory_space<vmem>>, vector<8x128xf32>
    %30 = vector.broadcast %28 : vector<8x1xf32> to vector<8x128xf32>
    %31 = arith.mulf %30, %19 : vector<8x128xf32>
    %32 = arith.addf %29, %31 : vector<8x128xf32>
    %c0_20 = arith.constant 0 : index
    %c0_21 = arith.constant 0 : index
    %33 = vector.load %arg4[%c0_20, %c0_21] : memref<8x128xf32, #tpu.memory_space<vmem>>, vector<8x128xf32>
    tpu.vector_store %arg4[%c0_20, %c0_21], %32 {strides = array<i32>} : memref<8x128xf32, #tpu.memory_space<vmem>>, vector<8x128xf32>,
    %c0_22 = arith.constant 0 : index
    %c2 = arith.constant 2 : index
    %c0_23 = arith.constant 0 : index
    %34 = vector.load %arg1[%c0_22, %c2, %c0_23] : memref<8x8x128xf32, #tpu.memory_space<vmem>>, vector<8x1x128xf32>
    %35 = vector.shape_cast %34 : vector<8x1x128xf32> to vector<8x128xf32>
    %c2_24 = arith.constant 2 : index
    %c0_25 = arith.constant 0 : index
    %36 = vector.load %arg2[%c2_24, %c0_25] : memref<8x128xf32, #tpu.memory_space<vmem>>, vector<1x128xf32>
    %37 = vector.broadcast %36 : vector<1x128xf32> to vector<8x128xf32>
    %38 = arith.mulf %35, %37 : vector<8x128xf32>
    %cst_26 = arith.constant dense<0.000000e+00> : vector<8xf32>
    %39 = vector.multi_reduction <add>, %38, %cst_26 [1] : vector<8x128xf32> to vector<8xf32>
    %40 = vector.shape_cast %39 : vector<8xf32> to vector<8x1xf32>
    %c2_27 = arith.constant 2 : index
    %41 = memref.load %arg3[%c2_27] : memref<8xf32, #tpu.memory_space<smem>>
    %42 = vector.broadcast %41 : f32 to vector<8x1xf32>
    %43 = arith.addf %40, %42 : vector<8x1xf32>
    %44 = math.tanh %43 : vector<8x1xf32>
    %c0_28 = arith.constant 0 : index
    %c0_29 = arith.constant 0 : index
    %45 = vector.load %arg4[%c0_28, %c0_29] : memref<8x128xf32, #tpu.memory_space<vmem>>, vector<8x128xf32>
    %46 = vector.broadcast %44 : vector<8x1xf32> to vector<8x128xf32>
    %47 = arith.mulf %46, %35 : vector<8x128xf32>
    %48 = arith.addf %45, %47 : vector<8x128xf32>
    %c0_30 = arith.constant 0 : index
    %c0_31 = arith.constant 0 : index
    %49 = vector.load %arg4[%c0_30, %c0_31] : memref<8x128xf32, #tpu.memory_space<vmem>>, vector<8x128xf32>
    tpu.vector_store %arg4[%c0_30, %c0_31], %48 {strides = array<i32>} : memref<8x128xf32, #tpu.memory_space<vmem>>, vector<8x128xf32>,
    %c0_32 = arith.constant 0 : index
    %c3 = arith.constant 3 : index
    %c0_33 = arith.constant 0 : index
    %50 = vector.load %arg1[%c0_32, %c3, %c0_33] : memref<8x8x128xf32, #tpu.memory_space<vmem>>, vector<8x1x128xf32>
    %51 = vector.shape_cast %50 : vector<8x1x128xf32> to vector<8x128xf32>
    %c3_34 = arith.constant 3 : index
    %c0_35 = arith.constant 0 : index
    %52 = vector.load %arg2[%c3_34, %c0_35] : memref<8x128xf32, #tpu.memory_space<vmem>>, vector<1x128xf32>
    %53 = vector.broadcast %52 : vector<1x128xf32> to vector<8x128xf32>
    %54 = arith.mulf %51, %53 : vector<8x128xf32>
    %cst_36 = arith.constant dense<0.000000e+00> : vector<8xf32>
    %55 = vector.multi_reduction <add>, %54, %cst_36 [1] : vector<8x128xf32> to vector<8xf32>
    %56 = vector.shape_cast %55 : vector<8xf32> to vector<8x1xf32>
    %c3_37 = arith.constant 3 : index
    %57 = memref.load %arg3[%c3_37] : memref<8xf32, #tpu.memory_space<smem>>
    %58 = vector.broadcast %57 : f32 to vector<8x1xf32>
    %59 = arith.addf %56, %58 : vector<8x1xf32>
    %60 = math.tanh %59 : vector<8x1xf32>
    %c0_38 = arith.constant 0 : index
    %c0_39 = arith.constant 0 : index
    %61 = vector.load %arg4[%c0_38, %c0_39] : memref<8x128xf32, #tpu.memory_space<vmem>>, vector<8x128xf32>
    %62 = vector.broadcast %60 : vector<8x1xf32> to vector<8x128xf32>
    %63 = arith.mulf %62, %51 : vector<8x128xf32>
    %64 = arith.addf %61, %63 : vector<8x128xf32>
    %c0_40 = arith.constant 0 : index
    %c0_41 = arith.constant 0 : index
    %65 = vector.load %arg4[%c0_40, %c0_41] : memref<8x128xf32, #tpu.memory_space<vmem>>, vector<8x128xf32>
    tpu.vector_store %arg4[%c0_40, %c0_41], %64 {strides = array<i32>} : memref<8x128xf32, #tpu.memory_space<vmem>>, vector<8x128xf32>,
    %c0_42 = arith.constant 0 : index
    %c4 = arith.constant 4 : index
    %c0_43 = arith.constant 0 : index
    %66 = vector.load %arg1[%c0_42, %c4, %c0_43] : memref<8x8x128xf32, #tpu.memory_space<vmem>>, vector<8x1x128xf32>
    %67 = vector.shape_cast %66 : vector<8x1x128xf32> to vector<8x128xf32>
    %c4_44 = arith.constant 4 : index
    %c0_45 = arith.constant 0 : index
    %68 = vector.load %arg2[%c4_44, %c0_45] : memref<8x128xf32, #tpu.memory_space<vmem>>, vector<1x128xf32>
    %69 = vector.broadcast %68 : vector<1x128xf32> to vector<8x128xf32>
    %70 = arith.mulf %67, %69 : vector<8x128xf32>
    %cst_46 = arith.constant dense<0.000000e+00> : vector<8xf32>
    %71 = vector.multi_reduction <add>, %70, %cst_46 [1] : vector<8x128xf32> to vector<8xf32>
    %72 = vector.shape_cast %71 : vector<8xf32> to vector<8x1xf32>
    %c4_47 = arith.constant 4 : index
    %73 = memref.load %arg3[%c4_47] : memref<8xf32, #tpu.memory_space<smem>>
    %74 = vector.broadcast %73 : f32 to vector<8x1xf32>
    %75 = arith.addf %72, %74 : vector<8x1xf32>
    %76 = math.tanh %75 : vector<8x1xf32>
    %c0_48 = arith.constant 0 : index
    %c0_49 = arith.constant 0 : index
    %77 = vector.load %arg4[%c0_48, %c0_49] : memref<8x128xf32, #tpu.memory_space<vmem>>, vector<8x128xf32>
    %78 = vector.broadcast %76 : vector<8x1xf32> to vector<8x128xf32>
    %79 = arith.mulf %78, %67 : vector<8x128xf32>
    %80 = arith.addf %77, %79 : vector<8x128xf32>
    %c0_50 = arith.constant 0 : index
    %c0_51 = arith.constant 0 : index
    %81 = vector.load %arg4[%c0_50, %c0_51] : memref<8x128xf32, #tpu.memory_space<vmem>>, vector<8x128xf32>
    tpu.vector_store %arg4[%c0_50, %c0_51], %80 {strides = array<i32>} : memref<8x128xf32, #tpu.memory_space<vmem>>, vector<8x128xf32>,
    %c0_52 = arith.constant 0 : index
    %c5 = arith.constant 5 : index
    %c0_53 = arith.constant 0 : index
    %82 = vector.load %arg1[%c0_52, %c5, %c0_53] : memref<8x8x128xf32, #tpu.memory_space<vmem>>, vector<8x1x128xf32>
    %83 = vector.shape_cast %82 : vector<8x1x128xf32> to vector<8x128xf32>
    %c5_54 = arith.constant 5 : index
    %c0_55 = arith.constant 0 : index
    %84 = vector.load %arg2[%c5_54, %c0_55] : memref<8x128xf32, #tpu.memory_space<vmem>>, vector<1x128xf32>
    %85 = vector.broadcast %84 : vector<1x128xf32> to vector<8x128xf32>
    %86 = arith.mulf %83, %85 : vector<8x128xf32>
    %cst_56 = arith.constant dense<0.000000e+00> : vector<8xf32>
    %87 = vector.multi_reduction <add>, %86, %cst_56 [1] : vector<8x128xf32> to vector<8xf32>
    %88 = vector.shape_cast %87 : vector<8xf32> to vector<8x1xf32>
    %c5_57 = arith.constant 5 : index
    %89 = memref.load %arg3[%c5_57] : memref<8xf32, #tpu.memory_space<smem>>
    %90 = vector.broadcast %89 : f32 to vector<8x1xf32>
    %91 = arith.addf %88, %90 : vector<8x1xf32>
    %92 = math.tanh %91 : vector<8x1xf32>
    %c0_58 = arith.constant 0 : index
    %c0_59 = arith.constant 0 : index
    %93 = vector.load %arg4[%c0_58, %c0_59] : memref<8x128xf32, #tpu.memory_space<vmem>>, vector<8x128xf32>
    %94 = vector.broadcast %92 : vector<8x1xf32> to vector<8x128xf32>
    %95 = arith.mulf %94, %83 : vector<8x128xf32>
    %96 = arith.addf %93, %95 : vector<8x128xf32>
    %c0_60 = arith.constant 0 : index
    %c0_61 = arith.constant 0 : index
    %97 = vector.load %arg4[%c0_60, %c0_61] : memref<8x128xf32, #tpu.memory_space<vmem>>, vector<8x128xf32>
    tpu.vector_store %arg4[%c0_60, %c0_61], %96 {strides = array<i32>} : memref<8x128xf32, #tpu.memory_space<vmem>>, vector<8x128xf32>,
    %c0_62 = arith.constant 0 : index
    %c6 = arith.constant 6 : index
    %c0_63 = arith.constant 0 : index
    %98 = vector.load %arg1[%c0_62, %c6, %c0_63] : memref<8x8x128xf32, #tpu.memory_space<vmem>>, vector<8x1x128xf32>
    %99 = vector.shape_cast %98 : vector<8x1x128xf32> to vector<8x128xf32>
    %c6_64 = arith.constant 6 : index
    %c0_65 = arith.constant 0 : index
    %100 = vector.load %arg2[%c6_64, %c0_65] : memref<8x128xf32, #tpu.memory_space<vmem>>, vector<1x128xf32>
    %101 = vector.broadcast %100 : vector<1x128xf32> to vector<8x128xf32>
    %102 = arith.mulf %99, %101 : vector<8x128xf32>
    %cst_66 = arith.constant dense<0.000000e+00> : vector<8xf32>
    %103 = vector.multi_reduction <add>, %102, %cst_66 [1] : vector<8x128xf32> to vector<8xf32>
    %104 = vector.shape_cast %103 : vector<8xf32> to vector<8x1xf32>
    %c6_67 = arith.constant 6 : index
    %105 = memref.load %arg3[%c6_67] : memref<8xf32, #tpu.memory_space<smem>>
    %106 = vector.broadcast %105 : f32 to vector<8x1xf32>
    %107 = arith.addf %104, %106 : vector<8x1xf32>
    %108 = math.tanh %107 : vector<8x1xf32>
    %c0_68 = arith.constant 0 : index
    %c0_69 = arith.constant 0 : index
    %109 = vector.load %arg4[%c0_68, %c0_69] : memref<8x128xf32, #tpu.memory_space<vmem>>, vector<8x128xf32>
    %110 = vector.broadcast %108 : vector<8x1xf32> to vector<8x128xf32>
    %111 = arith.mulf %110, %99 : vector<8x128xf32>
    %112 = arith.addf %109, %111 : vector<8x128xf32>
    %c0_70 = arith.constant 0 : index
    %c0_71 = arith.constant 0 : index
    %113 = vector.load %arg4[%c0_70, %c0_71] : memref<8x128xf32, #tpu.memory_space<vmem>>, vector<8x128xf32>
    tpu.vector_store %arg4[%c0_70, %c0_71], %112 {strides = array<i32>} : memref<8x128xf32, #tpu.memory_space<vmem>>, vector<8x128xf32>,
    %c0_72 = arith.constant 0 : index
    %c7 = arith.constant 7 : index
    %c0_73 = arith.constant 0 : index
    %114 = vector.load %arg1[%c0_72, %c7, %c0_73] : memref<8x8x128xf32, #tpu.memory_space<vmem>>, vector<8x1x128xf32>
    %115 = vector.shape_cast %114 : vector<8x1x128xf32> to vector<8x128xf32>
    %c7_74 = arith.constant 7 : index
    %c0_75 = arith.constant 0 : index
    %116 = vector.load %arg2[%c7_74, %c0_75] : memref<8x128xf32, #tpu.memory_space<vmem>>, vector<1x128xf32>
    %117 = vector.broadcast %116 : vector<1x128xf32> to vector<8x128xf32>
    %118 = arith.mulf %115, %117 : vector<8x128xf32>
    %cst_76 = arith.constant dense<0.000000e+00> : vector<8xf32>
    %119 = vector.multi_reduction <add>, %118, %cst_76 [1] : vector<8x128xf32> to vector<8xf32>
    %120 = vector.shape_cast %119 : vector<8xf32> to vector<8x1xf32>
    %c7_77 = arith.constant 7 : index
    %121 = memref.load %arg3[%c7_77] : memref<8xf32, #tpu.memory_space<smem>>
    %122 = vector.broadcast %121 : f32 to vector<8x1xf32>
    %123 = arith.addf %120, %122 : vector<8x1xf32>
    %124 = math.tanh %123 : vector<8x1xf32>
    %c0_78 = arith.constant 0 : index
    %c0_79 = arith.constant 0 : index
    %125 = vector.load %arg4[%c0_78, %c0_79] : memref<8x128xf32, #tpu.memory_space<vmem>>, vector<8x128xf32>
    %126 = vector.broadcast %124 : vector<8x1xf32> to vector<8x128xf32>
    %127 = arith.mulf %126, %115 : vector<8x128xf32>
    %128 = arith.addf %125, %127 : vector<8x128xf32>
    %c0_80 = arith.constant 0 : index
    %c0_81 = arith.constant 0 : index
    %129 = vector.load %arg4[%c0_80, %c0_81] : memref<8x128xf32, #tpu.memory_space<vmem>>, vector<8x128xf32>
    tpu.vector_store %arg4[%c0_80, %c0_81], %128 {strides = array<i32>} : memref<8x128xf32, #tpu.memory_space<vmem>>, vector<8x128xf32>,
    return
  }
  func.func @transform_0(%arg0: i32) -> (i32, i32, i32) {
    %c0_i32 = arith.constant 0 : i32
    %c0_i32_0 = arith.constant 0 : i32
    %c0_i32_1 = arith.constant 0 : i32
    return %arg0, %c0_i32, %c0_i32_0 : i32, i32, i32
  }
  func.func @transform_1(%arg0: i32) -> (i32, i32) {
    %c0_i32 = arith.constant 0 : i32
    %c0_i32_0 = arith.constant 0 : i32
    %c0_i32_1 = arith.constant 0 : i32
    return %c0_i32, %c0_i32_0 : i32, i32
  }
  func.func @transform_2(%arg0: i32) -> i32 {
    %c0_i32 = arith.constant 0 : i32
    %c0_i32_0 = arith.constant 0 : i32
    return %c0_i32 : i32
  }
  func.func @transform_3(%arg0: i32) -> (i32, i32) {
    %c0_i32 = arith.constant 0 : i32
    %c0_i32_0 = arith.constant 0 : i32
    return %arg0, %c0_i32 : i32, i32
  }
}

</mosaic_0001>

<bundles_post_ra>
// kernel: tpu_custom_call.1
= control target key start
LH: loop header
LB: loop body
LE: loop exit
PB: predicated region body
PF: predicated region fallthrough
CT: control target
= control target key end

     0   :  { %8 = vsyncpa [#allocation3], 0  ;;  %s1761_s0 = inlined_call_operand.hbm [shape: f32[16,8,128], index: 0, kind: input, shape index: {}]   ;;  %s1762_s1 = inlined_call_operand.hbm [shape: f32[8,128], index: 1, kind: input, shape index: {}]   ;;  %s1763_s2 = inlined_call_operand.vmem [shape: f32[8], index: 2, kind: input, shape index: {}]   ;;  %s1764_s3 = inlined_call_operand.hbm [shape: f32[16,128], index: 3, kind: output, shape index: {}]  }
   0x1   :  { %10 = vsyncpa [#allocation3 + $0x1], 0 }
   0x2   :  { %11 = vsyncpa [#allocation7], 0 }
   0x3   :  { %12 = vsyncpa [#allocation5], 0 }
   0x4   :  { %13 = vsyncpa [#allocation4], 0 }
   0x5   :  { %15 = vsyncpa [#allocation4 + $0x1], 0  ;;  %s1241_s12 = smov 0   ;;  %s1243_s13 = smov 0  }
   0x6   :  { %s1245_s14 = smov 0   ;;  %s1247_s15 = smov 0  }
   0x7 LB: > { %s1262_s16 = sadd.s32 4294967295, %s1213_s15   ;;  %s947_s17 = sadd.s32 4294967294, %s1213_s15   ;;  %s1213_s15 = sphi %s1247_s15, %s1791_s15   ;;  %s1209_s14 = sphi %s1245_s14, %s1790_s14   ;;  %s1205_s13 = sphi %s1243_s13, %s1789_s13   ;;  %s1201_s12 = sphi %s1241_s12, %s1788_s12  }
   0x8   : > { %s1266_s18 = sadd.s32 1, %s1213_s15   ;;  %s28_s19 = sadd.s32 1, %s1209_s14 }
   0x9   : > { %s25_s20 = ssub.s32 %s1213_s15, %s1266_s18  ;;  %p35_p0 = scmp.ne.s32.totalorder %s1209_s14, %s1205_s13 }
   0xa   : > { %p26_p1 = scmp.eq.s32.totalorder %s25_s20, 0  ;;  %p36_p2 = scmp.eq.s32.totalorder %s1213_s15, 0 }
   0xb   : > { %p41_p3 = scmp.ne.s32.totalorder %s1205_s13, %s1201_s12  ;;  %p1765_p4 = scmp.eq.s32.totalorder %s1262_s16, 0 }
   0xc   : > { %s1278_s21 = scalar_select %p26_p1, %s1209_s14, %s28_s19  }
   0xd   : > { %p1280_p5 = por %p36_p2, %p35_p0  ;;  %p1286_p6 = por %p1765_p4, %p41_p3 }
   0xe   : > { %p107_p7 = scmp.eq.s32.totalorder %s1262_s16, 1  ;;  %p113_p8 = scmp.eq.s32.totalorder %s947_s17, 1 }
   0xf   : > { %s1771_s23 = scalar_select %p1286_p6, 1, 0 }
  0x10   : > { %p948_p9 = scmp.ge.s32.totalorder %s1213_s15, 1  ;;  %p120_p10 = scmp.lt.s32.totalorder %s1213_s15, 3 }
  0x11   : > { %p1293_p11 = por %p107_p7, %p35_p0  ;;  %p1297_p12 = por %p113_p8, %p41_p3 }
  0x12   : > { %p1301_p13 = pnand %p948_p9, %p120_p10  ;;  %s1215_s27 = smov [#allocation6]  }
  0x13   : > { %s1772_s24 = scalar_select %p1293_p11, 1, 0 }
  0x14   : > { %s1773_s25 = scalar_select %p1297_p12, 1, 0 }
  0x15   : > { %s1774_s26 = scalar_select %p1301_p13, 1, 0 }
  0x16   : > { %p992_p2 = pneg %p1301_p13  ;;  %s133_s28 = sshll.u32 %s1215_s27, 4  ;;  %s134_s28 = int_to_ptr.vmem [resolvable:$true] %s133_s28 }
  0x17   : > { %p1009_p4 = scmp.lt.s32.totalorder %s1213_s15, 2  ;;  %p1775_p0 = scmp.eq.s32.totalorder %s1262_s16, 0 }
  0x18   : > { %s144_s5 = sshll.u32 %s1763_s2, 4  ;;  %s1066_s9 = scalar_lea.hbm %s1762_s1, 128  ;;  %s1324_s5 = int_to_ptr.vmem [resolvable:$true] %s144_s5 }
  0x19   : > { %p1311_p7 = pnand %p992_p2, %p1775_p0  ;;  %p1320_p3 = pnand %p1009_p4, %p1280_p5 }
  0x1a   : > { %p1067_p8 = scmp.ne.s32.totalorder %s1762_s1, %s1066_s9  ;;  %p1073_p4 = scmp.lt.u32.totalorder %s1066_s9, %s1762_s1 }
  0x1b   : > { %s1777_s6 = scalar_select %p1320_p3, 1, 0 }
  0x1c   : > { %p1068_p9 = pneg %p1311_p7 }
  0x1e   : > { %p1069_p10 = pnand %p1068_p9, %p1067_p8 }
  0x20   : > { %p1070_p2 = pneg %p1069_p10 }
  0x22   : > { %p1075_p5 = pnand %p1073_p4, %p1070_p2 }
  0x24   : > { %1078 = shalt.err (!%p1075_p5)
}
  0x25   : > { %s1079_s20 = scalar_lea.vmem %s134_s28, 128  ;;  %p1087_p11 = scmp.lt.s32.totalorder %s134_s28, %s134_s28 }
  0x26   : > { %p1080_p0 = scmp.ne.s32.totalorder %s134_s28, %s1079_s20  ;;  %p1088_p6 = scmp.lt.s32.totalorder %s1079_s20, %s1079_s20 }
  0x28   : > { %p1082_p1 = pnand %p1080_p0, %p1068_p9  ;;  %p1089_p13 = por %p1088_p6, %p1087_p11 }
  0x2a   : > { %p1083_p12 = pneg %p1082_p1 }
  0x2c   : > { %p1090_p3 = pnand %p1089_p13, %p1083_p12 }
  0x2e   : > { %1093 = shalt.err (!%p1090_p3)
}
  0x2f   : > { %995 = dma.hbm_to_vmem [thread:$0]  (!%p1311_p7), %s1762_s1, 128, %s134_s28, [#allocation7]  }
  0x30   : > { %s155_s30 = sand.u32 1, %s1209_s14   ;;  %s1094_s4 = scalar_lea.vmem %s1324_s5, 16 }
  0x31   : > { %p1095_p8 = scmp.ne.s32.totalorder %s1324_s5, %s1094_s4  ;;  %p1102_p11 = scmp.lt.s32.totalorder %s1324_s5, %s1324_s5 }
  0x32   : > { %p1103_p12 = scmp.lt.s32.totalorder %s1094_s4, %s1094_s4 }
  0x33   : > { %p1097_p1 = pnand %p1095_p8, %p1068_p9 }
  0x34   : > { %p1104_p13 = por %p1103_p12, %p1102_p11 }
  0x35   : > { %p1098_p6 = pneg %p1097_p1 }
  0x37   : > { %p1105_p3 = pnand %p1104_p13, %p1098_p6 }
  0x39   : > { %1108 = shalt.err (!%p1105_p3)
}
  0x3a   : > { %s1216_s7 = smov [#allocation8]   ;;  %s952_s28 = sshll.u32 %s155_s30, 6 }
  0x3b   : > { %998 = dma.vmem_to_smem (!%p1311_p7), %s1324_s5, 16, %s1216_s7, [#allocation5]  }
  0x3c   : > { %s979_s8 = sshll.u32 %s1213_s15, 10  ;;  %s159_s17 = scalar_lea.vmem [#allocation2], %s952_s28 }
  0x3d   : > { %s1363_s11 = scalar_lea.hbm %s1761_s0, %s979_s8  ;;  %s166_s19 = sshll.u32 %s159_s17, 4  ;;  %s1365_s19 = int_to_ptr.vmem [resolvable:$true] %s166_s19 }
  0x3e   : > { %s1367_s29 = scalar_lea.sflag [#allocation3], %s155_s30  ;;  %s1109_s20 = scalar_lea.hbm %s1363_s11, 1024 }
  0x3f   : > { %p1110_p9 = scmp.ne.s32.totalorder %s1363_s11, %s1109_s20  ;;  %p1778_p7 = scmp.ne.s32.totalorder %s1777_s6, 0 }
  0x40   : > { %s1114_s27 = scalar_lea.hbm %s1761_s0, 2048  ;;  %p1115_p5 = scmp.lt.u32.totalorder %s1363_s11, %s1761_s0 }
  0x41   : > { %p1111_p10 = pneg %p1778_p7  ;;  %p1116_p0 = scmp.lt.u32.totalorder %s1114_s27, %s1109_s20 }
  0x42   : > { %p1118_p1 = scmp.lt.u32.totalorder %s1109_s20, %s1363_s11 }
  0x43   : > { %p1112_p2 = pnand %p1111_p10, %p1110_p9  ;;  %p1117_p8 = por %p1116_p0, %p1115_p5 }
  0x45   : > { %p1113_p4 = pneg %p1112_p2  ;;  %p1119_p6 = por %p1118_p1, %p1117_p8 }
  0x47   : > { %p1120_p11 = pnand %p1119_p6, %p1113_p4 }
  0x49   : > { %1123 = shalt.err (!%p1120_p11)
}
  0x4a   : > { %s1124_s30 = scalar_lea.vmem %s1365_s19, 1024  ;;  %s1217_s28 = smov [#allocation2]  }
  0x4b   : > { %p1125_p12 = scmp.ne.s32.totalorder %s1365_s19, %s1124_s30  ;;  %s1129_s8 = sshll.u32 %s1217_s28, 4  ;;  %s1130_s8 = int_to_ptr.vmem [resolvable:$false] %s1129_s8 }
  0x4c   : > { %s1131_s9 = scalar_lea.vmem %s1130_s8, 2048  ;;  %p1132_p9 = scmp.lt.s32.totalorder %s1365_s19, %s1130_s8 }
  0x4d   : > { %p1127_p13 = pnand %p1125_p12, %p1111_p10  ;;  %p1133_p2 = scmp.lt.s32.totalorder %s1131_s9, %s1124_s30 }
  0x4f   : > { %p1128_p3 = pneg %p1127_p13  ;;  %p1134_p5 = por %p1133_p2, %p1132_p9 }
  0x51   : > { %p1135_p0 = pnand %p1134_p5, %p1128_p3 }
  0x53   : > { %1138 = shalt.err (!%p1135_p0)
}
  0x54   : > { %s1218_s10 = smov 128   ;;  %s1219_s17 = smov 8  }
  0x55   : > { %1002 = dma.hbm_to_vmem [thread:$0]  (!%p1778_p7), %s1363_s11, 1024, %s1365_s19, %s1367_s29, %s1218_s10, %s1218_s10, %s1219_s17  }
  0x56   : > { %p1779_p10 = scmp.ne.s32.totalorder %s1774_s26, 0 }
  0x57   : > { %s1398_s20 = sand.u32 (!%p1779_p10), 1, %s1205_s13   ;;  %p1780_p4 = scmp.ne.s32.totalorder (!%p1779_p10), %s1771_s23, 0 }
  0x58   : > { %178 = sbr.rel (%p1779_p10) target bundleno = 356 (0x164), region = 32  ;;  %s956_s5 = sshll.u32 (!%p1779_p10), %s1398_s20, 6 }
  0x59   : > { %s181_s22 = scalar_lea.sflag (!%p1779_p10), [#allocation3], %s1398_s20  ;;  %s1402_s27 = scalar_lea.vmem (!%p1779_p10), [#allocation2], %s956_s5 }
  0x5f   : > { %1184 = dma.done.wait (%p1780_p4), %s181_s22, 1024  }
  0x60   : > { %1186 = vsyncadd (%p1780_p4), %s181_s22, 4294966272  ;;  %p1781_p7 = scmp.eq.s32.totalorder %s1262_s16, 0 }
  0x62   : > { %1188 = dma.done.wait (%p1781_p7), [#allocation7], 128   ;;  %p1782_p8 = pmov %p1781_p7 }
  0x63   : > { %p1783_p1 = pmov %p1781_p7 }
  0x64   : > { %1190 = vsyncadd (%p1782_p8), [#allocation7], 4294967168 }
  0x65   : > { %1192 = dma.done.wait (%p1783_p1), [#allocation5], 16   ;;  %p1784_p6 = pmov %p1783_p1 }
  0x67   : > { %1194 = vsyncadd (%p1784_p6), [#allocation5], 4294967280 }
  0x68   : > { %197 = sfence }
  0x69   : > { %v218_v0 = vld [vmem:[%s1402_s27] sm:$0x1]  ;;  %v219_v1 = vld [vmem:[%s1402_s27 + $0x8] sm:$0x1]  ;;  %v220_v2 = vld [vmem:[%s1402_s27 + $0x10] sm:$0x1] }
  0x6a   : > { %v221_v3 = vld [vmem:[%s1402_s27 + $0x18] sm:$0x1]  ;;  %v222_v4 = vld [vmem:[%s1402_s27 + $0x20] sm:$0x1]  ;;  %v1422_v5 = vld [vmem:[%s1402_s27 + $0x28] sm:$0x1] }
  0x6b   : > { %v1425_v6 = vld [vmem:[%s1402_s27 + $0x30] sm:$0x1]  ;;  %v1428_v7 = vld [vmem:[%s1402_s27 + $0x38] sm:$0x1]  ;;  %v960_v8 = vld [vmem:[#allocation6] ss:$0 sm:$0xff] }
  0x6c   : > { %v231_v9 = vmul.f32 %v960_v8, %v218_v0  ;;  %v232_v10 = vmul.f32 %v960_v8, %v219_v1  ;;  %v233_v11 = vmul.f32 %v960_v8, %v220_v2  ;;  %v234_v12 = vmul.f32 %v960_v8, %v221_v3  ;;  %v1434_v21 = vld [vmem:[%s1402_s27 + $0x1] sm:$0x1]  ;;  %v303_v25 = vld [vmem:[%s1402_s27 + $0x9] sm:$0x1]  ;;  %v1439_v26 = vld [vmem:[%s1402_s27 + $0x11] sm:$0x1] }
  0x6d   : > { %v235_v13 = vmul.f32 %v960_v8, %v222_v4  ;;  %v236_v14 = vmul.f32 %v960_v8, %v1422_v5  ;;  %v237_v15 = vmul.f32 %v960_v8, %v1425_v6  ;;  %v238_v16 = vmul.f32 %v960_v8, %v1428_v7  ;;  %v1443_v29 = vld [vmem:[%s1402_s27 + $0x19] sm:$0x1]  ;;  %v1446_v30 = vld [vmem:[%s1402_s27 + $0x21] sm:$0x1]  ;;  %v1453_v40 = vld [vmem:[%s1402_s27 + $0x29] sm:$0x1] }
  0x6e   : > { %v247_v17 = vrot.slane %v232_v10, 7  ;;  %vm248_vm0 = vcmask 1041409   ;;  %v250_v18 = vrot.slane %v233_v11, 6  ;;  %vm251_vm1 = vcmask 1042434   ;;  %v961_v35 = vld [vmem:[#allocation6 + $0x1] ss:$0 sm:$0xff] }
  0x6f   : > { %v253_v19 = vrot.slane %v234_v12, 5  ;;  %vm254_vm2 = vcmask 1043459   ;;  %v256_v20 = vrot.slane %v235_v13, 4  ;;  %vm257_vm3 = vcmask 1044484   ;;  %v1459_v44 = vld [vmem:[%s1402_s27 + $0x31] sm:$0x1] }
  0x70   : > { %v249_v22 = vsel %vm248_vm0, %v247_v17, %v231_v9  ;;  %v259_v23 = vrot.slane %v236_v14, 3  ;;  %vm260_vm4 = vcmask 1045509   ;;  %v262_v24 = vrot.slane %v237_v15, 2  ;;  %v1462_v45 = vld [vmem:[%s1402_s27 + $0x39] sm:$0x1]  ;;  %s271_s23 = sld [smem:[#allocation8]] }
  0x71   : > { %v252_v27 = vsel %vm251_vm1, %v250_v18, %v249_v22  ;;  %vm263_vm5 = vcmask 1046534   ;;  %v265_v28 = vrot.slane %v238_v16, 1  ;;  %vm266_vm6 = vcmask 1047559   ;;  %v380_v8 = vld [vmem:[%s1402_s27 + $0xa] sm:$0x1]  ;;  %s962_s26 = sld [smem:[#allocation8 + $0x1]] }
  0x72   : > { %v255_v31 = vsel %vm254_vm2, %v253_v19, %v252_v27  ;;  %v284_v32 = vrot.slane %v219_v1, 7  ;;  %v286_v33 = vrot.slane %v220_v2, 6  ;;  %v288_v34 = vrot.slane %v221_v3, 5  ;;  %v379_v3 = vld [vmem:[%s1402_s27 + $0x2] sm:$0x1]  ;;  %s964_s6 = sld [smem:[#allocation8 + $0x2]] }
  0x73   : > { %v258_v36 = vsel %vm257_vm3, %v256_v20, %v255_v31  ;;  %v290_v37 = vrot.slane %v222_v4, 4  ;;  %v292_v38 = vrot.slane %v1422_v5, 3  ;;  %v294_v39 = vrot.slane %v1425_v6, 2  ;;  %v381_v9 = vld [vmem:[%s1402_s27 + $0x12] sm:$0x1]  ;;  %s966_s11 = sld [smem:[#allocation8 + $0x3]] }
  0x74   : > { %v261_v41 = vsel %vm260_vm4, %v259_v23, %v258_v36  ;;  %v285_v42 = vsel %vm248_vm0, %v284_v32, %v218_v0  ;;  %v296_v43 = vrot.slane %v1428_v7, 1  ;;  %v315_v46 = vmul.f32 %v961_v35, %v1434_v21  ;;  %v963_v14 = vld [vmem:[#allocation6 + $0x2] ss:$0 sm:$0xff]  ;;  %v382_v19 = vld [vmem:[%s1402_s27 + $0x1a] sm:$0x1]  ;;  %s968_s19 = sld [smem:[#allocation8 + $0x4]] }
  0x75   : > { %v264_v47 = vsel %vm263_vm5, %v262_v24, %v261_v41  ;;  %v287_v48 = vsel %vm251_vm1, %v286_v33, %v285_v42  ;;  %v316_v49 = vmul.f32 %v961_v35, %v303_v25  ;;  %v317_v50 = vmul.f32 %v961_v35, %v1439_v26  ;;  %v383_v20 = vld [vmem:[%s1402_s27 + $0x22] sm:$0x1]  ;;  %s970_s29 = sld [smem:[#allocation8 + $0x5]]  ;;  %s972_s4 = sld [smem:[#allocation8 + $0x6]] }
  0x76   : > { %v267_v51 = vsel %vm266_vm6, %v265_v28, %v264_v47  ;;  %v289_v52 = vsel %vm254_vm2, %v288_v34, %v287_v48  ;;  %v318_v53 = vmul.f32 %v961_v35, %v1443_v29  ;;  %v319_v54 = vmul.f32 %v961_v35, %v1446_v30  ;;  %s974_s7 = sld [smem:[#allocation8 + $0x7]]  ;;  %s959_s30 = sshll.u32 %s1398_s20, 3 }
  0x77   : > { %v291_v55 = vsel %vm257_vm3, %v290_v37, %v289_v52  ;;  %269 = vadd.xlane.f32.xlu0 %v267_v51  ;;  %v320_v56 = vmul.f32 %v961_v35, %v1453_v40  ;;  %v321_v57 = vmul.f32 %v961_v35, %v1459_v44  ;;  %v322_v58 = vmul.f32 %v961_v35, %v1462_v45  ;;  %s976_s28 = sshll.u32 %s1262_s16, 7  ;;  %s215_s8 = scalar_lea.vmem [#allocation9], %s959_s30 }
  0x78   : > { %v293_v59 = vsel %vm260_vm4, %v292_v38, %v291_v55  ;;  %v331_v60 = vrot.slane %v316_v49, 7  ;;  %v333_v61 = vrot.slane %v317_v50, 6  ;;  %v335_v62 = vrot.slane %v318_v53, 5  ;;  %v457_v49 = vld [vmem:[%s1402_s27 + $0xb] sm:$0x1]  ;;  %s855_s9 = sshll.u32 %s215_s8, 4  ;;  %s1717_s5 = scalar_lea.hbm %s1764_s3, %s976_s28  ;;  %s1719_s9 = int_to_ptr.vmem [resolvable:$true] %s855_s9 }
  0x79   : > { %v295_v63 = vsel %vm263_vm5, %v294_v39, %v293_v59  ;;  %v337_v0 = vrot.slane %v319_v54, 4  ;;  %v339_v1 = vrot.slane %v320_v56, 3  ;;  %v341_v2 = vrot.slane %v321_v57, 2  ;;  %v458_v54 = vld [vmem:[%s1402_s27 + $0x13] sm:$0x1]  ;;  %s842_s22 = scalar_lea.sflag [#allocation4], %s1398_s20 }
  0x7a   : > { %v1480_v4 = vsel %vm266_vm6, %v296_v43, %v295_v63  ;;  %v332_v5 = vsel %vm248_vm0, %v331_v60, %v315_v46  ;;  %v343_v6 = vrot.slane %v322_v58, 1  ;;  %v361_v7 = vrot.slane %v303_v25, 7  ;;  %v384_v25 = vld [vmem:[%s1402_s27 + $0x2a] sm:$0x1]  ;;  %v965_v59 = vld [vmem:[#allocation6 + $0x3] ss:$0 sm:$0xff] }
  0x7b   : > { %v334_v10 = vsel %vm251_vm1, %v333_v61, %v332_v5  ;;  %v363_v11 = vrot.slane %v1439_v26, 6  ;;  %v365_v12 = vrot.slane %v1443_v29, 5  ;;  %v367_v13 = vrot.slane %v1446_v30, 4  ;;  %v1501_v26 = vld [vmem:[%s1402_s27 + $0x32] sm:$0x1]  ;;  %p1785_p12 = scmp.ne.s32.totalorder %s1772_s24, 0 }
  0x7c   : > { %v336_v15 = vsel %vm254_vm2, %v335_v62, %v334_v10  ;;  %v362_v16 = vsel %vm248_vm0, %v361_v7, %v1434_v21  ;;  %v369_v17 = vrot.slane %v1453_v40, 3  ;;  %v371_v18 = vrot.slane %v1459_v44, 2  ;;  %v1506_v29 = vld [vmem:[%s1402_s27 + $0x3a] sm:$0x1]  ;;  %v1516_v44 = vld [vmem:[%s1402_s27 + $0x3] sm:$0x1] }
  0x7d   : > { %v338_v22 = vsel %vm257_vm3, %v337_v0, %v336_v15  ;;  %v364_v23 = vsel %vm251_vm1, %v363_v11, %v362_v16  ;;  %v373_v24 = vrot.slane %v1462_v45, 1  ;;  %v392_v27 = vmul.f32 %v963_v14, %v379_v3  ;;  %v459_v0 = vld [vmem:[%s1402_s27 + $0x1b] sm:$0x1]  ;;  %v461_v7 = vld [vmem:[%s1402_s27 + $0x2b] sm:$0x1]  ;;  %s1220_s16 = smov [#allocation9]  }
  0x7e   : > { %v340_v28 = vsel %vm260_vm4, %v339_v1, %v338_v22  ;;  %v366_v21 = vsel %vm254_vm2, %v365_v12, %v364_v23  ;;  %v393_v30 = vmul.f32 %v963_v14, %v380_v8  ;;  %v394_v31 = vmul.f32 %v963_v14, %v381_v9  ;;  %v460_v1 = vld [vmem:[%s1402_s27 + $0x23] sm:$0x1]  ;;  %v1541_v11 = vld [vmem:[%s1402_s27 + $0x3b] sm:$0x1] }
  0x7f   : > { %v342_v32 = vsel %vm263_vm5, %v341_v2, %v340_v28  ;;  %v368_v33 = vsel %vm257_vm3, %v367_v13, %v366_v21  ;;  %v395_v34 = vmul.f32 %v963_v14, %v382_v19  ;;  %v396_v35 = vmul.f32 %v963_v14, %v383_v20 }
  0x80   : > { %v344_v36 = vsel %vm266_vm6, %v343_v6, %v342_v32  ;;  %v370_v37 = vsel %vm260_vm4, %v369_v17, %v368_v33  ;;  %v397_v38 = vmul.f32 %v963_v14, %v384_v25  ;;  %v398_v39 = vmul.f32 %v963_v14, %v1501_v26 }
  0x81   : > { %v372_v40 = vsel %vm263_vm5, %v371_v18, %v370_v37  ;;  %346 = vadd.xlane.f32.xlu0 %v344_v36  ;;  %v399_v41 = vmul.f32 %v963_v14, %v1506_v29  ;;  %v408_v42 = vrot.slane %v393_v30, 7  ;;  %v410_v43 = vrot.slane %v394_v31, 6  ;;  %v534_v31 = vld [vmem:[%s1402_s27 + $0xc] sm:$0x1]  ;;  %v535_v36 = vld [vmem:[%s1402_s27 + $0x14] sm:$0x1] }
  0x82   : > { %v1519_v45 = vsel %vm266_vm6, %v373_v24, %v372_v40  ;;  %v412_v46 = vrot.slane %v395_v34, 5  ;;  %v414_v47 = vrot.slane %v396_v35, 4  ;;  %v416_v48 = vrot.slane %v397_v38, 3 }
  0x83   : > { %v409_v50 = vsel %vm248_vm0, %v408_v42, %v392_v27  ;;  %v418_v51 = vrot.slane %v398_v39, 2  ;;  %v420_v52 = vrot.slane %v399_v41, 1  ;;  %v438_v53 = vrot.slane %v380_v8, 7  ;;  %v1535_v8 = vld [vmem:[%s1402_s27 + $0x33] sm:$0x1] }
  0x84   : > { %v411_v55 = vsel %vm251_vm1, %v410_v43, %v409_v50  ;;  %v440_v56 = vrot.slane %v381_v9, 6  ;;  %v442_v57 = vrot.slane %v382_v19, 5  ;;  %v444_v58 = vrot.slane %v383_v20, 4  ;;  %v1551_v27 = vld [vmem:[%s1402_s27 + $0x4] sm:$0x1] }
  0x85   : > { %v413_v60 = vsel %vm254_vm2, %v412_v46, %v411_v55  ;;  %v439_v61 = vsel %vm248_vm0, %v438_v53, %v379_v3  ;;  %v446_v62 = vrot.slane %v384_v25, 3  ;;  %v448_v63 = vrot.slane %v1501_v26, 2  ;;  %v967_v41 = vld [vmem:[#allocation6 + $0x4] ss:$0 sm:$0xff]  ;;  %v538_v53 = vld [vmem:[%s1402_s27 + $0x2c] sm:$0x1] }
  0x86   : > { %v415_v2 = vsel %vm257_vm3, %v414_v47, %v413_v60  ;;  %v441_v5 = vsel %vm251_vm1, %v440_v56, %v439_v61  ;;  %v450_v6 = vrot.slane %v1506_v29, 1  ;;  %v469_v9 = vmul.f32 %v965_v59, %v1516_v44 }
  0x87   : > { %v417_v10 = vsel %vm260_vm4, %v416_v48, %v415_v2  ;;  %v443_v3 = vsel %vm254_vm2, %v442_v57, %v441_v5  ;;  %v470_v12 = vmul.f32 %v965_v59, %v457_v49  ;;  %v471_v13 = vmul.f32 %v965_v59, %v458_v54  ;;  %v536_v48 = vld [vmem:[%s1402_s27 + $0x1c] sm:$0x1] }
  0x88   : > { %v419_v14 = vsel %vm263_vm5, %v418_v51, %v417_v10  ;;  %v445_v15 = vsel %vm257_vm3, %v444_v58, %v443_v3  ;;  %v472_v16 = vmul.f32 %v965_v59, %v459_v0  ;;  %v473_v17 = vmul.f32 %v965_v59, %v460_v1  ;;  %v1577_v57 = vld [vmem:[%s1402_s27 + $0x3c] sm:$0x1]  ;;  %v1587_v10 = vld [vmem:[%s1402_s27 + $0x5] sm:$0x1] }
  0x89   : > { %v421_v18 = vsel %vm266_vm6, %v420_v52, %v419_v14  ;;  %v447_v19 = vsel %vm260_vm4, %v446_v62, %v445_v15  ;;  %v474_v20 = vmul.f32 %v965_v59, %v461_v7  ;;  %v475_v22 = vmul.f32 %v965_v59, %v1535_v8  ;;  %v611_v14 = vld [vmem:[%s1402_s27 + $0xd] sm:$0x1] }
  0x8a   : > { %v449_v23 = vsel %vm263_vm5, %v448_v63, %v447_v19  ;;  %423 = vadd.xlane.f32.xlu1 %v421_v18  ;;  %v476_v24 = vmul.f32 %v965_v59, %v1541_v11  ;;  %v485_v25 = vrot.slane %v470_v12, 7  ;;  %v487_v26 = vrot.slane %v471_v13, 6  ;;  %v612_v19 = vld [vmem:[%s1402_s27 + $0x15] sm:$0x1] }
  0x8b   : > { %v1554_v28 = vsel %vm266_vm6, %v450_v6, %v449_v23  ;;  %v489_v21 = vrot.slane %v472_v16, 5  ;;  %v491_v29 = vrot.slane %v473_v17, 4  ;;  %v493_v30 = vrot.slane %v474_v20, 3 }
  0x8c   : > { %v486_v32 = vsel %vm248_vm0, %v485_v25, %v469_v9  ;;  %v495_v33 = vrot.slane %v475_v22, 2  ;;  %v497_v34 = vrot.slane %v476_v24, 1  ;;  %v515_v35 = vrot.slane %v457_v49, 7  ;;  %v537_v49 = vld [vmem:[%s1402_s27 + $0x24] sm:$0x1] }
  0x8d   : > { %v488_v37 = vsel %vm251_vm1, %v487_v26, %v486_v32  ;;  %v517_v38 = vrot.slane %v458_v54, 6  ;;  %v519_v39 = vrot.slane %v459_v0, 5  ;;  %v521_v40 = vrot.slane %v460_v1, 4  ;;  %v1571_v54 = vld [vmem:[%s1402_s27 + $0x34] sm:$0x1] }
  0x8e   : > { %v490_v42 = vsel %vm254_vm2, %v489_v21, %v488_v37  ;;  %v516_v43 = vsel %vm248_vm0, %v515_v35, %v1516_v44  ;;  %v523_v46 = vrot.slane %v461_v7, 3  ;;  %v525_v47 = vrot.slane %v1535_v8, 2  ;;  %v969_v25 = vld [vmem:[#allocation6 + $0x5] ss:$0 sm:$0xff]  ;;  %v613_v32 = vld [vmem:[%s1402_s27 + $0x1d] sm:$0x1] }
  0x8f   : > { %v492_v50 = vsel %vm257_vm3, %v491_v29, %v490_v42  ;;  %v518_v51 = vsel %vm251_vm1, %v517_v38, %v516_v43  ;;  %v527_v52 = vrot.slane %v1541_v11, 1  ;;  %v546_v55 = vmul.f32 %v967_v41, %v1551_v27  ;;  %v1607_v37 = vld [vmem:[%s1402_s27 + $0x35] sm:$0x1] }
  0x90   : > { %v494_v56 = vsel %vm260_vm4, %v493_v30, %v492_v50  ;;  %v520_v44 = vsel %vm254_vm2, %v519_v39, %v518_v51  ;;  %v547_v58 = vmul.f32 %v967_v41, %v534_v31  ;;  %v548_v59 = vmul.f32 %v967_v41, %v535_v36 }
  0x91   : > { %v496_v60 = vsel %vm263_vm5, %v495_v33, %v494_v56  ;;  %v522_v61 = vsel %vm257_vm3, %v521_v40, %v520_v44  ;;  %v549_v62 = vmul.f32 %v967_v41, %v536_v48  ;;  %v550_v63 = vmul.f32 %v967_v41, %v537_v49  ;;  %v1613_v40 = vld [vmem:[%s1402_s27 + $0x3d] sm:$0x1]  ;;  %v1623_v44 = vld [vmem:[%s1402_s27 + $0x6] sm:$0x1] }
  0x92   : > { %v498_v0 = vsel %vm266_vm6, %v497_v34, %v496_v60  ;;  %v524_v1 = vsel %vm260_vm4, %v523_v46, %v522_v61  ;;  %v551_v2 = vmul.f32 %v967_v41, %v538_v53  ;;  %v552_v5 = vmul.f32 %v967_v41, %v1571_v54  ;;  %v688_v61 = vld [vmem:[%s1402_s27 + $0xe] sm:$0x1] }
  0x93   : > { %v526_v6 = vsel %vm263_vm5, %v525_v47, %v524_v1  ;;  %500 = vadd.xlane.f32.xlu1 %v498_v0  ;;  %v553_v7 = vmul.f32 %v967_v41, %v1577_v57  ;;  %v562_v8 = vrot.slane %v547_v58, 7  ;;  %v564_v9 = vrot.slane %v548_v59, 6 }
  0x94   : > { %v1590_v3 = vsel %vm266_vm6, %v527_v52, %v526_v6  ;;  %v566_v11 = vrot.slane %v549_v62, 5  ;;  %v568_v12 = vrot.slane %v550_v63, 4  ;;  %v570_v13 = vrot.slane %v551_v2, 3  ;;  %v689_v2 = vld [vmem:[%s1402_s27 + $0x16] sm:$0x1] }
  0x95   : > { %v563_v15 = vsel %vm248_vm0, %v562_v8, %v546_v55  ;;  %v572_v16 = vrot.slane %v552_v5, 2  ;;  %v574_v17 = vrot.slane %v553_v7, 1  ;;  %v592_v18 = vrot.slane %v534_v31, 7  ;;  %v614_v31 = vld [vmem:[%s1402_s27 + $0x25] sm:$0x1] }
  0x96   : > { %v565_v20 = vsel %vm251_vm1, %v564_v9, %v563_v15  ;;  %v594_v22 = vrot.slane %v535_v36, 6  ;;  %v596_v23 = vrot.slane %v536_v48, 5  ;;  %v598_v24 = vrot.slane %v537_v49, 4  ;;  %v615_v36 = vld [vmem:[%s1402_s27 + $0x2d] sm:$0x1] }
  0x97   : > { %v567_v26 = vsel %vm254_vm2, %v566_v11, %v565_v20  ;;  %v593_v21 = vsel %vm248_vm0, %v592_v18, %v1551_v27  ;;  %v600_v29 = vrot.slane %v538_v53, 3  ;;  %v602_v30 = vrot.slane %v1571_v54, 2  ;;  %v971_v9 = vld [vmem:[#allocation6 + $0x6] ss:$0 sm:$0xff]  ;;  %v692_v20 = vld [vmem:[%s1402_s27 + $0x2e] sm:$0x1] }
  0x98   : > { %v569_v33 = vsel %vm257_vm3, %v568_v12, %v567_v26  ;;  %v595_v34 = vsel %vm251_vm1, %v594_v22, %v593_v21  ;;  %v604_v35 = vrot.slane %v1577_v57, 1  ;;  %v623_v38 = vmul.f32 %v969_v25, %v1587_v10  ;;  %v1643_v22 = vld [vmem:[%s1402_s27 + $0x36] sm:$0x1] }
  0x99   : > { %v571_v39 = vsel %vm260_vm4, %v570_v13, %v569_v33  ;;  %v597_v27 = vsel %vm254_vm2, %v596_v23, %v595_v34  ;;  %v624_v41 = vmul.f32 %v969_v25, %v611_v14  ;;  %v625_v42 = vmul.f32 %v969_v25, %v612_v19 }
  0x9a   : > { %v573_v43 = vsel %vm263_vm5, %v572_v16, %v571_v39  ;;  %v599_v46 = vsel %vm257_vm3, %v598_v24, %v597_v27  ;;  %v626_v47 = vmul.f32 %v969_v25, %v613_v32  ;;  %v627_v48 = vmul.f32 %v969_v25, %v614_v31  ;;  %v690_v16 = vld [vmem:[%s1402_s27 + $0x1e] sm:$0x1] }
  0x9b   : > { %v575_v49 = vsel %vm266_vm6, %v574_v17, %v573_v43  ;;  %v601_v50 = vsel %vm260_vm4, %v600_v29, %v599_v46  ;;  %v628_v51 = vmul.f32 %v969_v25, %v615_v36  ;;  %v629_v52 = vmul.f32 %v969_v25, %v1607_v37 }
  0x9c   : > { %v603_v53 = vsel %vm263_vm5, %v602_v30, %v601_v50  ;;  %577 = vadd.xlane.f32.xlu0 %v575_v49  ;;  %v630_v54 = vmul.f32 %v969_v25, %v1613_v40  ;;  %v639_v55 = vrot.slane %v624_v41, 7  ;;  %v641_v56 = vrot.slane %v625_v42, 6  ;;  %v1649_v25 = vld [vmem:[%s1402_s27 + $0x3e] sm:$0x1] }
  0x9d   : > { %v1626_v57 = vsel %vm266_vm6, %v604_v35, %v603_v53  ;;  %v643_v58 = vrot.slane %v626_v47, 5  ;;  %v645_v59 = vrot.slane %v627_v48, 4  ;;  %v647_v60 = vrot.slane %v628_v51, 3  ;;  %v765_v47 = vld [vmem:[%s1402_s27 + $0xf] sm:$0x1] }
  0x9e   : > { %v640_v62 = vsel %vm248_vm0, %v639_v55, %v623_v38  ;;  %v649_v63 = vrot.slane %v629_v52, 2  ;;  %v651_v0 = vrot.slane %v630_v54, 1  ;;  %v669_v1 = vrot.slane %v611_v14, 7  ;;  %v691_v14 = vld [vmem:[%s1402_s27 + $0x26] sm:$0x1] }
  0x9f   : > { %v642_v5 = vsel %vm251_vm1, %v641_v56, %v640_v62  ;;  %v671_v6 = vrot.slane %v612_v19, 6  ;;  %v673_v7 = vrot.slane %v613_v32, 5  ;;  %v675_v8 = vrot.slane %v614_v31, 4  ;;  %v766_v52 = vld [vmem:[%s1402_s27 + $0x17] sm:$0x1] }
  0xa0   : > { %v644_v11 = vsel %vm254_vm2, %v643_v58, %v642_v5  ;;  %v670_v12 = vsel %vm248_vm0, %v669_v1, %v1587_v10  ;;  %v677_v13 = vrot.slane %v615_v36, 3  ;;  %v679_v15 = vrot.slane %v1607_v37, 2  ;;  %v973_v58 = vld [vmem:[#allocation6 + $0x7] ss:$0 sm:$0xff] }
  0xa1   : > { %v646_v17 = vsel %vm257_vm3, %v645_v59, %v644_v11  ;;  %v672_v18 = vsel %vm251_vm1, %v671_v6, %v670_v12  ;;  %v681_v19 = vrot.slane %v1613_v40, 1  ;;  %v700_v23 = vmul.f32 %v971_v9, %v1623_v44  ;;  %v764_v40 = vld [vmem:[%s1402_s27 + $0x7] sm:$0x1]  ;;  %v769_v6 = vld [vmem:[%s1402_s27 + $0x2f] sm:$0x1] }
  0xa2   : > { %v648_v24 = vsel %vm260_vm4, %v647_v60, %v646_v17  ;;  %v674_v10 = vsel %vm254_vm2, %v673_v7, %v672_v18  ;;  %v701_v26 = vmul.f32 %v971_v9, %v688_v61  ;;  %v702_v21 = vmul.f32 %v971_v9, %v689_v2  ;;  %v770_v7 = vld [vmem:[%s1402_s27 + $0x37] sm:$0x1]  ;;  %v771_v12 = vld [vmem:[%s1402_s27 + $0x3f] sm:$0x1] }
  0xa3   : > { %v650_v29 = vsel %vm263_vm5, %v649_v63, %v648_v24  ;;  %v676_v30 = vsel %vm257_vm3, %v675_v8, %v674_v10  ;;  %v703_v32 = vmul.f32 %v971_v9, %v690_v16  ;;  %v704_v31 = vmul.f32 %v971_v9, %v691_v14 }
  0xa4   : > { %v652_v33 = vsel %vm266_vm6, %v651_v0, %v650_v29  ;;  %v678_v34 = vsel %vm260_vm4, %v677_v13, %v676_v30  ;;  %v705_v35 = vmul.f32 %v971_v9, %v692_v20  ;;  %v706_v36 = vmul.f32 %v971_v9, %v1643_v22  ;;  %v767_v0 = vld [vmem:[%s1402_s27 + $0x1f] sm:$0x1] }
  0xa5   : > { %v680_v37 = vsel %vm263_vm5, %v679_v15, %v678_v34  ;;  %654 = vadd.xlane.f32.xlu1 %v652_v33  ;;  %v707_v38 = vmul.f32 %v971_v9, %v1649_v25  ;;  %v716_v39 = vrot.slane %v701_v26, 7  ;;  %v718_v27 = vrot.slane %v702_v21, 6 }
  0xa6   : > { %v1660_v41 = vsel %vm266_vm6, %v681_v19, %v680_v37  ;;  %v720_v42 = vrot.slane %v703_v32, 5  ;;  %v722_v43 = vrot.slane %v704_v31, 4  ;;  %v724_v46 = vrot.slane %v705_v35, 3 }
  0xa7   : > { %v717_v48 = vsel %vm248_vm0, %v716_v39, %v700_v23  ;;  %v726_v49 = vrot.slane %v706_v36, 2  ;;  %v728_v50 = vrot.slane %v707_v38, 1  ;;  %v746_v51 = vrot.slane %v688_v61, 7  ;;  %v768_v61 = vld [vmem:[%s1402_s27 + $0x27] sm:$0x1]  ;;  %s1139_s27 = scalar_lea.vmem %s1719_s9, 128 }
  0xa8   : > { %v719_v53 = vsel %vm251_vm1, %v718_v27, %v717_v48  ;;  %v748_v54 = vrot.slane %v689_v2, 6  ;;  %v750_v55 = vrot.slane %v690_v16, 5  ;;  %v752_v56 = vrot.slane %v691_v14, 4  ;;  %p1140_p11 = scmp.ne.s32.totalorder %s1719_s9, %s1139_s27 }
  0xa9   : > { %v721_v59 = vsel %vm254_vm2, %v720_v42, %v719_v53  ;;  %v747_v60 = vsel %vm248_vm0, %v746_v51, %v1623_v44  ;;  %v754_v62 = vrot.slane %v692_v20, 3  ;;  %v756_v63 = vrot.slane %v1643_v22, 2 }
  0xaa   : > { %v723_v1 = vsel %vm257_vm3, %v722_v43, %v721_v59  ;;  %v749_v5 = vsel %vm251_vm1, %v748_v54, %v747_v60  ;;  %v758_v2 = vrot.slane %v1649_v25, 1  ;;  %v777_v8 = vmul.f32 %v973_v58, %v764_v40  ;;  %p1141_p13 = pnand %p1140_p11, %p1785_p12 }
  0xab   : > { %v725_v9 = vsel %vm260_vm4, %v724_v46, %v723_v1  ;;  %v751_v11 = vsel %vm254_vm2, %v750_v55, %v749_v5  ;;  %v778_v44 = vmul.f32 %v973_v58, %v765_v47  ;;  %v779_v13 = vmul.f32 %v973_v58, %v766_v52 }
  0xac   : > { %v727_v15 = vsel %vm263_vm5, %v726_v49, %v725_v9  ;;  %v753_v16 = vsel %vm257_vm3, %v752_v56, %v751_v11  ;;  %v780_v14 = vmul.f32 %v973_v58, %v767_v0  ;;  %v781_v17 = vmul.f32 %v973_v58, %v768_v61  ;;  %p1142_p3 = pneg %p1141_p13 }
  0xad   : > { %v729_v18 = vsel %vm266_vm6, %v728_v50, %v727_v15  ;;  %v755_v19 = vsel %vm260_vm4, %v754_v62, %v753_v16  ;;  %v782_v20 = vmul.f32 %v973_v58, %v769_v6  ;;  %v783_v22 = vmul.f32 %v973_v58, %v770_v7 }
  0xae   : > { %v757_v23 = vsel %vm263_vm5, %v756_v63, %v755_v19  ;;  %731 = vadd.xlane.f32.xlu0 %v729_v18  ;;  %v784_v24 = vmul.f32 %v973_v58, %v771_v12  ;;  %v793_v10 = vrot.slane %v778_v44, 7  ;;  %v795_v25 = vrot.slane %v779_v13, 6 }
  0xaf   : > { %v1686_v26 = vsel %vm266_vm6, %v758_v2, %v757_v23  ;;  %v797_v21 = vrot.slane %v780_v14, 5  ;;  %v799_v29 = vrot.slane %v781_v17, 4  ;;  %v801_v32 = vrot.slane %v782_v20, 3 }
  0xb0   : > { %v794_v30 = vsel %vm248_vm0, %v793_v10, %v777_v8  ;;  %v823_v31 = vrot.slane %v765_v47, 7  ;;  %v803_v34 = vrot.slane %v783_v22, 2  ;;  %v805_v36 = vrot.slane %v784_v24, 1 }
  0xb1   : > { %v796_v33 = vsel %vm251_vm1, %v795_v25, %v794_v30  ;;  %v825_v43 = vrot.slane %v766_v52, 6  ;;  %v827_v46 = vrot.slane %v767_v0, 5  ;;  %v829_v47 = vrot.slane %v768_v61, 4 }
  0xb2   : > { %v798_v35 = vsel %vm254_vm2, %v797_v21, %v796_v33  ;;  %v824_v37 = vsel %vm248_vm0, %v823_v31, %v764_v40  ;;  %v831_v48 = vrot.slane %v769_v6, 3  ;;  %v833_v49 = vrot.slane %v770_v7, 2 }
  0xb3   : > { %v800_v38 = vsel %vm257_vm3, %v799_v29, %v798_v35  ;;  %v826_v50 = vsel %vm251_vm1, %v825_v43, %v824_v37  ;;  %v835_v51 = vrot.slane %v771_v12, 1  ;;  %v272_v52 = vstv %s271_s23  ;;  %s1143_s23 = sshll.u32 %s1220_s16, 4  ;;  %s1144_s23 = int_to_ptr.vmem [resolvable:$false] %s1143_s23 }
  0xb4   : > { %v802_v39 = vsel %vm260_vm4, %v801_v32, %v800_v38  ;;  %v828_v53 = vsel %vm254_vm2, %v827_v46, %v826_v50  ;;  %v349_v60 = vstv %s962_s26  ;;  %v426_v61 = vstv %s964_s6  ;;  %s1145_s26 = scalar_lea.vmem %s1144_s23, 256  ;;  %p1146_p9 = scmp.lt.s32.totalorder %s1719_s9, %s1144_s23 }
  0xb5   : > { %v804_v27 = vsel %vm263_vm5, %v803_v34, %v802_v39  ;;  %v830_v40 = vsel %vm257_vm3, %v829_v47, %v828_v53  ;;  %v503_v9 = vstv %s966_s11  ;;  %v580_v16 = vstv %s968_s19  ;;  %p1147_p2 = scmp.lt.s32.totalorder %s1145_s26, %s1139_s27 }
  0xb6   : > { %v806_v42 = vsel %vm266_vm6, %v805_v36, %v804_v27  ;;  %v832_v54 = vsel %vm260_vm4, %v831_v48, %v830_v40  ;;  %v734_v10 = vstv %s972_s4  ;;  %v811_v32 = vstv %s974_s7 }
  0xb7   : > { %808 = vadd.xlane.f32.xlu1 %v806_v42  ;;  %v834_v55 = vsel %vm263_vm5, %v833_v49, %v832_v54  ;;  %p1148_p5 = por %p1147_p2, %p1146_p9 }
  0xb8   : > { %v1702_v56 = vsel %vm266_vm6, %v835_v51, %v834_v55 }
  0xb9   : > { %p1149_p0 = pnand %p1148_p5, %p1142_p3 }
 0x104   : > { %v270_v58 = vpop.xlane.xlu0 %269 }
 0x105   : > { %v273_v59 = vadd.f32 %v272_v52, %v270_v58 }
 0x107   : > { %1050 = vtanh.f32 %v273_v59 }
 0x10e   : > { %v347_v62 = vpop.xlane.xlu0 %346 }
 0x10f   : > { %v350_v63 = vadd.f32 %v349_v60, %v347_v62 }
 0x111   : > { %1052 = vtanh.f32 %v350_v63  ;;  %v1051_v0 = vpop.eup %1050 }
 0x112   : > { %v299_v5 = vmul.f32 %v1051_v0, %v1480_v4 }
 0x117   : > { %v424_v1 = vpop.xlane.xlu1 %423 }
 0x118   : > { %v427_v2 = vadd.f32 %v426_v61, %v424_v1 }
 0x11a   : > { %1054 = vtanh.f32 %v427_v2 }
 0x11b   : > { %v1053_v6 = vpop.eup %1052 }
 0x11c   : > { %v376_v7 = vmul.f32 %v1053_v6, %v1519_v45  ;;  %v657_v45 = vstv %s970_s29 }
 0x11e   : > { %v377_v8 = vadd.f32 %v376_v7, %v299_v5 }
 0x120   : > { %v501_v11 = vpop.xlane.xlu1 %500 }
 0x121   : > { %v504_v12 = vadd.f32 %v503_v9, %v501_v11 }
 0x123   : > { %1056 = vtanh.f32 %v504_v12 }
 0x124   : > { %v1055_v44 = vpop.eup %1054 }
 0x125   : > { %v453_v13 = vmul.f32 %v1055_v44, %v1554_v28 }
 0x127   : > { %v454_v15 = vadd.f32 %v453_v13, %v377_v8 }
 0x129   : > { %v578_v14 = vpop.xlane.xlu0 %577 }
 0x12a   : > { %v581_v17 = vadd.f32 %v580_v16, %v578_v14 }
 0x12c   : > { %1058 = vtanh.f32 %v581_v17 }
 0x12d   : > { %v1057_v4 = vpop.eup %1056 }
 0x12e   : > { %v530_v18 = vmul.f32 %v1057_v4, %v1590_v3 }
 0x130   : > { %v531_v19 = vadd.f32 %v530_v18, %v454_v15 }
 0x132   : > { %v655_v20 = vpop.xlane.xlu1 %654 }
 0x133   : > { %v658_v22 = vadd.f32 %v657_v45, %v655_v20 }
 0x135   : > { %1060 = vtanh.f32 %v658_v22 }
 0x136   : > { %v1059_v23 = vpop.eup %1058 }
 0x137   : > { %v607_v24 = vmul.f32 %v1059_v23, %v1626_v57 }
 0x139   : > { %v608_v28 = vadd.f32 %v607_v24, %v531_v19 }
 0x13b   : > { %v732_v25 = vpop.xlane.xlu0 %731 }
 0x13c   : > { %v735_v21 = vadd.f32 %v734_v10, %v732_v25 }
 0x13e   : > { %1062 = vtanh.f32 %v735_v21 }
 0x13f   : > { %v1061_v29 = vpop.eup %1060 }
 0x140   : > { %v684_v3 = vmul.f32 %v1061_v29, %v1660_v41 }
 0x142   : > { %v685_v30 = vadd.f32 %v684_v3, %v608_v28 }
 0x144   : > { %v809_v31 = vpop.xlane.xlu1 %808 }
 0x145   : > { %v812_v33 = vadd.f32 %v811_v32, %v809_v31 }
 0x147   : > { %1064 = vtanh.f32 %v812_v33 }
 0x148   : > { %v1063_v34 = vpop.eup %1062 }
 0x149   : > { %v761_v57 = vmul.f32 %v1063_v34, %v1686_v26 }
 0x14b   : > { %v762_v35 = vadd.f32 %v761_v57, %v685_v30 }
 0x151   : > { %v1065_v36 = vpop.eup %1064 }
 0x152   : > { %v838_v37 = vmul.f32 %v1065_v36, %v1702_v56 }
 0x154   : > { %v839_v38 = vadd.f32 %v838_v37, %v762_v35 }
 0x156   : > { %840 = vst [vmem:[%s215_s8] sm:$0xff] %v839_v38 }
 0x157   : > { %1152 = shalt.err (!%p1149_p0)
}
 0x158   : > { %s1153_s20 = scalar_lea.hbm %s1717_s5, 128  ;;  %s1157_s19 = scalar_lea.hbm %s1764_s3, 256 }
 0x159   : > { %p1154_p10 = scmp.ne.s32.totalorder %s1717_s5, %s1153_s20  ;;  %p1158_p8 = scmp.lt.u32.totalorder %s1717_s5, %s1764_s3 }
 0x15a   : > { %p1159_p1 = scmp.lt.u32.totalorder %s1157_s19, %s1153_s20  ;;  %p1161_p11 = scmp.lt.u32.totalorder %s1153_s20, %s1717_s5 }
 0x15b   : > { %p1155_p4 = pnand %p1154_p10, %p1785_p12 }
 0x15c   : > { %p1160_p6 = por %p1159_p1, %p1158_p8 }
 0x15d   : > { %p1156_p7 = pneg %p1155_p4 }
 0x15e   : > { %p1162_p13 = por %p1161_p11, %p1160_p6 }
 0x160   : > { %p1163_p3 = pnand %p1162_p13, %p1156_p7 }
 0x162   : > { %1166 = shalt.err (!%p1163_p3)
}
 0x163   : > { %990 = dma.vmem_to_hbm [thread:$0]  (%p1785_p12), %s1719_s9, 128, %s1717_s5, %s842_s22  }
 0x164 PF: > { %s867_s7 = sand.u32 1, %s1201_s12   ;;  %p1786_p9 = scmp.ne.s32.totalorder %s1773_s25, 0 }
 0x165   : > { %p1787_p2 = scmp.ge.s32.totalorder %s1213_s15, 2  ;;  %s868_s30 = scalar_lea.sflag [#allocation4], %s867_s7 }
 0x167   : > { %p1004_p5 = pnand %p1787_p2, %p1786_p9 }
 0x169   : > { %1196 = dma.done.wait (!%p1004_p5), %s868_s30, 128  }
 0x16a   : > { %1198 = vsyncadd (!%p1004_p5), %s868_s30, 4294967168  ;;  %p18_p0 = scmp.ge.s32.totalorder %s1266_s18, 4   ;;  %s1788_s12 = smov %s1205_s13 }
 0x16b   : > { %s1789_s13 = smov %s1209_s14  ;;  %s1790_s14 = smov %s1278_s21 }
 0x16c   : > { %s1791_s15 = smov %s1266_s18  ;;  %20 = sbr.rel (!%p18_p0) target bundleno = 7 (0x7), region = 86 }
 0x173   :  { %873 = vsyncpa [#allocation3], 1 }
 0x174   :  { %875 = vsyncpa [#allocation3 + $0x1], 1 }
 0x175   :  { %876 = vsyncpa [#allocation7], 1 }
 0x176   :  { %877 = vsyncpa [#allocation4], 1 }
 0x177   :  { %879 = vsyncpa [#allocation4 + $0x1], 1 }
 0x178   :  { %880 = vsyncpa [#allocation5], 1 }
 0x179   :  { %882 = vsyncpa [#allocation5 + $0x1], 1 }

</bundles_post_ra>
